<compile_context>
chip_gen: v6e
topology: v6e:2x2x1
jax: 0.10.0
libtpu: 0.0.40
codegen_flags: <defaults>
</compile_context>

<pallas_src>
import jax
import jax.numpy as jnp
from jax import lax
from jax.experimental import pallas as pl
from jax.experimental.pallas import tpu as pltpu

_UNROLL_LIMIT = 64   # fully unroll the time loop up to this many steps


def encoder_lstm_seq_kernel(xg_ref, h0_ref, c0_ref, wh_ref,
                            h_out_ref, c_out_ref):
    """Full-sequence LSTM encoder step loop.

    xg_ref    : VMEM (T,4H)        pre-gathered emb@Wi + b rows (gate order f,i,c,o)
    h0_ref    : VMEM (1,H)  f32    initial hidden state
    c0_ref    : VMEM (1,H)  f32    initial cell state
    wh_ref    : VMEM (H,4H)        [Whf.T | Whi.T | Whc.T | Who.T]
    h_out_ref : VMEM (T,H)  f32    Ht for every step ("output")
    c_out_ref : VMEM (T,H)  f32    Ct for every step ("hidden" per module quirk)
    """
    H = h0_ref.shape[-1]
    T = xg_ref.shape[0]

    # Loop-invariant recurrent weight: read once, stays resident in vregs /
    # staged for the MXU across all T steps.
    wh = wh_ref[...]                                          # (H, 4H)
    mxu_dtype = wh.dtype

    def cell(xg, h, c):
        # Recurrent projection: single MXU matmul per step, f32 accumulation.
        gates = xg.astype(jnp.float32) + jnp.dot(
            h.astype(mxu_dtype), wh,
            preferred_element_type=jnp.float32)               # (1, 4H)
        # Two EUP passes over the full 4H-lane vreg (instead of 4 sub-vreg
        # transcendentals); gate extraction is lane slicing of activated vregs.
        s = jax.nn.sigmoid(gates)
        th = jnp.tanh(gates)
        f = s[:, 0 * H:1 * H]
        i = s[:, 1 * H:2 * H]
        g = th[:, 2 * H:3 * H]
        o = s[:, 3 * H:4 * H]
        c_new = f * c + i * g
        h_new = o * jnp.tanh(c_new)
        return h_new, c_new

    h = h0_ref[...]
    c = c0_ref[...]

    if T <= _UNROLL_LIMIT:
        # Fully unrolled: static slices, state in vregs, one slab store per
        # output at the end (no per-step masked (1,H) stores).
        h_rows, c_rows = [], []
        for t in range(T):
            xg = xg_ref[pl.ds(t, 1), :]                       # static slice
            h, c = cell(xg, h, c)
            h_rows.append(h)
            c_rows.append(c)
        h_out_ref[...] = jnp.concatenate(h_rows, axis=0)
        c_out_ref[...] = jnp.concatenate(c_rows, axis=0)
    else:
        # Long sequences: partially-unrolled fori_loop keeps code size bounded
        # while giving the scheduler cross-step visibility.
        def step(t, carry):
            h, c = carry
            xg = xg_ref[pl.ds(t, 1), :]
            h_new, c_new = cell(xg, h, c)
            h_out_ref[pl.ds(t, 1), :] = h_new
            c_out_ref[pl.ds(t, 1), :] = c_new
            return h_new, c_new

        lax.fori_loop(0, T, step, (h, c), unroll=8)


def encoder_rnn_sequence(tokens, hidden_tuple, params, *,
                         mxu_dtype=jnp.float32):
    """Run the encoder over a whole token sequence in ONE pallas_call.

    Returns (h_seq, c_seq), each (T, H); row t is exactly what the PyTorch
    module's forward would return (reshaped) as (output, hidden) at step t
    when its state is threaded step by step.  NOTE: per the module's
    unpacking quirk, the "hidden" it returns is the CELL state (c_seq row t).

    mxu_dtype=jnp.bfloat16 is the recommended production setting on v6e/v7x
    for realistic H (halves weight/activation VMEM + DMA; f32 accumulation and
    f32 gate math are kept).  Default f32 for exact parity with the reference.
    """
    h0, c0 = hidden_tuple
    V, H4 = params["Xg"].shape
    H = H4 // 4
    # Clamp OOV ids (PyTorch's nn.Embedding would raise instead).
    tokens = jnp.clip(tokens.astype(jnp.int32).reshape(-1), 0, V - 1)
    T = tokens.shape[0]

    # Per-token input-projection rows gathered OUTSIDE the kernel: the
    # kernel's VMEM footprint scales with T, not V, and the vocab gather is
    # off the serial recurrence.  Bias is already fused into Xg in f32.
    xg_seq = params["Xg"][tokens]                             # (T, 4H) f32
    wh = params["Wh"]                                         # (H, 4H) f32
    if mxu_dtype != jnp.float32:
        xg_seq = xg_seq.astype(mxu_dtype)
        wh = wh.astype(mxu_dtype)

    h_seq, c_seq = pl.pallas_call(
        encoder_lstm_seq_kernel,
        out_shape=(jax.ShapeDtypeStruct((T, H), jnp.float32),
                   jax.ShapeDtypeStruct((T, H), jnp.float32)),
        in_specs=[
            pl.BlockSpec(memory_space=pltpu.VMEM),   # xg_seq (T, 4H)
            pl.BlockSpec(memory_space=pltpu.VMEM),   # h0     (1, H)
            pl.BlockSpec(memory_space=pltpu.VMEM),   # c0     (1, H)
            pl.BlockSpec(memory_space=pltpu.VMEM),   # Wh     (H, 4H)
        ],
        out_specs=(pl.BlockSpec(memory_space=pltpu.VMEM),
                   pl.BlockSpec(memory_space=pltpu.VMEM)),
        compiler_params=pltpu.CompilerParams(
            # Tiny footprint now that only (T,4H) + (H,4H) are resident;
            # explicit limit keeps the config portable (v7x: 64 MiB physical).
            vmem_limit_bytes=32 * 1024 * 1024),
    )(xg_seq,
      h0.reshape(1, H).astype(jnp.float32),
      c0.reshape(1, H).astype(jnp.float32),
      wh)
    return h_seq, c_seq


def encoder_rnn_forward(token, hidden_tuple, params):
    """Mirrors EncoderRNN.forward for a single token: returns
    (output, hidden) == (Ht, Ct), each shaped (1, 1, H).
    (The returned "hidden" is the cell state, matching the module's quirk.)"""
    h_seq, c_seq = encoder_rnn_sequence(token, hidden_tuple, params)
    H = h_seq.shape[-1]
    return h_seq[:1].reshape(1, 1, H), c_seq[:1].reshape(1, 1, H)


def init_params(key, vocab_size, hidden_size):
    """Deterministic synthetic parameters matching the module's shapes.
    The eight Linear(H,H) layers are fused into (H, 4H) slabs (gate order
    [f,i,c,o]); the input-side projection is precomputed into Xg (V, 4H),
    with the bias sum done in f32."""
    ks = jax.random.split(key, 17)
    H = hidden_size
    emb = jax.random.normal(ks[0], (vocab_size, H), jnp.float32) * 0.1

    def lin(kw, kb):  # PyTorch Linear: weight (out,in), bias (out,)
        w = jax.random.normal(kw, (H, H), jnp.float32) * 0.1
        b = jax.random.normal(kb, (H,), jnp.float32) * 0.1
        return w, b

    (Wif, bif), (Whf, bhf) = lin(ks[1], ks[2]), lin(ks[3], ks[4])
    (Wii, bii), (Whi, bhi) = lin(ks[5], ks[6]), lin(ks[7], ks[8])
    (Wic, bic), (Whc, bhc) = lin(ks[9], ks[10]), lin(ks[11], ks[12])
    (Wio, bio), (Who, bho) = lin(ks[13], ks[14]), lin(ks[15], ks[16])

    Wi = jnp.concatenate([Wif.T, Wii.T, Wic.T, Wio.T], axis=1)     # (H, 4H)
    Wh = jnp.concatenate([Whf.T, Whi.T, Whc.T, Who.T], axis=1)     # (H, 4H)
    b = jnp.concatenate([bif + bhf, bii + bhi, bic + bhc, bio + bho])[None, :]
    Xg = emb @ Wi + b                                              # (V, 4H) f32

    raw = dict(Wif=Wif, bif=bif, Whf=Whf, bhf=bhf, Wii=Wii, bii=bii,
               Whi=Whi, bhi=bhi, Wic=Wic, bic=bic, Whc=Whc, bhc=bhc,
               Wio=Wio, bio=bio, Who=Who, bho=bho)
    return {"emb": emb, "Wi": Wi, "Wh": Wh, "b": b, "Xg": Xg, "raw": raw}


def reference_step(tok, h, c, params):
    """Pure-JAX replica of the PyTorch math (per-gate Linears), for validation."""
    r = params["raw"]
    x = params["emb"][tok]                          # (H,)
    lin = lambda W, b, v: v @ W.T + b
    Ft = jax.nn.sigmoid(lin(r["Wif"], r["bif"], x) + lin(r["Whf"], r["bhf"], h))
    It = jax.nn.sigmoid(lin(r["Wii"], r["bii"], x) + lin(r["Whi"], r["bhi"], h))
    C = jnp.tanh(lin(r["Wic"], r["bic"], x) + lin(r["Whc"], r["bhc"], h))
    Ct = Ft * c + It * C
    Ot = jax.nn.sigmoid(lin(r["Wio"], r["bio"], x) + lin(r["Who"], r["bho"], h))
    Ht = Ot * jnp.tanh(Ct)
    return Ht, Ct


if __name__ == "__main__":
    VOCAB = 16      # EncoderRNN input_size (vocabulary size)
    HIDDEN = 32     # hidden_size
    SEQ = 8         # number of timesteps fused into one pallas_call

    key = jax.random.PRNGKey(0)
    k_param, k_tok, k_h, k_c = jax.random.split(key, 4)

    params = init_params(k_param, VOCAB, HIDDEN)
    tokens = jax.random.randint(k_tok, (SEQ,), 0, VOCAB, dtype=jnp.int32)
    # get_initial_hidden_state() is zeros; use small random state to exercise math.
    h0 = jax.random.normal(k_h, (1, 1, HIDDEN), jnp.float32) * 0.1
    c0 = jax.random.normal(k_c, (1, 1, HIDDEN), jnp.float32) * 0.1

    # (1) Single-step path: exactly the module's forward() signature/semantics.
    out, hid = encoder_rnn_forward(tokens[:1], (h0, c0), params)
    out = jax.block_until_ready(out)
    hid = jax.block_until_ready(hid)
    ref_h, ref_c = reference_step(tokens[0], h0.reshape(-1), c0.reshape(-1), params)
    assert out.shape == (1, 1, HIDDEN) and hid.shape == (1, 1, HIDDEN)
    assert jnp.allclose(out.reshape(-1), ref_h, atol=1e-4, rtol=1e-4)
    assert jnp.allclose(hid.reshape(-1), ref_c, atol=1e-4, rtol=1e-4)

    # (2) Sequence-fused path: one pallas_call for all SEQ recurrent steps.
    h_seq, c_seq = encoder_rnn_sequence(tokens, (h0, c0), params)
    h_seq = jax.block_until_ready(h_seq)
    c_seq = jax.block_until_ready(c_seq)
    h, c = h0.reshape(-1), c0.reshape(-1)
    for t in range(SEQ):
        h, c = reference_step(tokens[t], h, c, params)
        assert jnp.allclose(h_seq[t], h, atol=1e-4, rtol=1e-4)
        assert jnp.allclose(c_seq[t], c, atol=1e-4, rtol=1e-4)

    print("KERNEL_OK")
</pallas_src>

<mosaic_0001>
module attributes {stable_mosaic.version = 11 : i64} {
  func.func @encoder_lstm_seq_kernel(%arg0: memref<1x128xf32, #tpu.memory_space<vmem>>, %arg1: memref<1x32xf32, #tpu.memory_space<vmem>>, %arg2: memref<1x32xf32, #tpu.memory_space<vmem>>, %arg3: memref<32x128xf32, #tpu.memory_space<vmem>>, %arg4: memref<1x32xf32, #tpu.memory_space<vmem>>, %arg5: memref<1x32xf32, #tpu.memory_space<vmem>>) attributes {dimension_semantics = [], scalar_prefetch = 0 : i64, scratch_operands = 0 : i64, tpu.core_type = #tpu.core_type<tc>} {
    %c0 = arith.constant 0 : index
    %c0_0 = arith.constant 0 : index
    %0 = vector.load %arg3[%c0, %c0_0] : memref<32x128xf32, #tpu.memory_space<vmem>>, vector<32x128xf32>
    %c0_1 = arith.constant 0 : index
    %c0_2 = arith.constant 0 : index
    %1 = vector.load %arg1[%c0_1, %c0_2] : memref<1x32xf32, #tpu.memory_space<vmem>>, vector<1x32xf32>
    %c0_3 = arith.constant 0 : index
    %c0_4 = arith.constant 0 : index
    %2 = vector.load %arg2[%c0_3, %c0_4] : memref<1x32xf32, #tpu.memory_space<vmem>>, vector<1x32xf32>
    %c0_5 = arith.constant 0 : index
    %c0_6 = arith.constant 0 : index
    %3 = vector.load %arg0[%c0_5, %c0_6] : memref<1x128xf32, #tpu.memory_space<vmem>>, vector<1x128xf32>
    %cst = arith.constant dense<0.000000e+00> : vector<1x128xf32>
    %4 = tpu.matmul %1, %0, %cst {dimension_numbers = #tpu.dot_dimension_numbers<[1], [0], [0], [1], [0, 0, 1, 1], [], []>} : vector<1x32xf32>, vector<32x128xf32>, vector<1x128xf32> -> vector<1x128xf32>
    %5 = arith.addf %3, %4 : vector<1x128xf32>
    %6 = arith.negf %5 : vector<1x128xf32>
    %7 = math.exp %6 : vector<1x128xf32>
    %cst_7 = arith.constant 1.000000e+00 : f32
    %8 = vector.broadcast %cst_7 : f32 to vector<1x128xf32>
    %9 = arith.addf %8, %7 : vector<1x128xf32>
    %10 = arith.divf %8, %9 : vector<1x128xf32>
    %11 = math.tanh %5 : vector<1x128xf32>
    %12 = vector.extract_strided_slice %10 {offsets = [0, 0], sizes = [1, 32], strides = [1, 1]} : vector<1x128xf32> to vector<1x32xf32>
    %13 = vector.extract_strided_slice %10 {offsets = [0, 32], sizes = [1, 32], strides = [1, 1]} : vector<1x128xf32> to vector<1x32xf32>
    %14 = vector.extract_strided_slice %11 {offsets = [0, 64], sizes = [1, 32], strides = [1, 1]} : vector<1x128xf32> to vector<1x32xf32>
    %15 = vector.extract_strided_slice %10 {offsets = [0, 96], sizes = [1, 32], strides = [1, 1]} : vector<1x128xf32> to vector<1x32xf32>
    %16 = arith.mulf %12, %2 : vector<1x32xf32>
    %17 = arith.mulf %13, %14 : vector<1x32xf32>
    %18 = arith.addf %16, %17 : vector<1x32xf32>
    %19 = math.tanh %18 : vector<1x32xf32>
    %20 = arith.mulf %15, %19 : vector<1x32xf32>
    %c0_8 = arith.constant 0 : index
    %c0_9 = arith.constant 0 : index
    %21 = vector.load %arg4[%c0_8, %c0_9] : memref<1x32xf32, #tpu.memory_space<vmem>>, vector<1x32xf32>
    tpu.vector_store %arg4[%c0_8, %c0_9], %20 {strides = array<i32>} : memref<1x32xf32, #tpu.memory_space<vmem>>, vector<1x32xf32>,
    %c0_10 = arith.constant 0 : index
    %c0_11 = arith.constant 0 : index
    %22 = vector.load %arg5[%c0_10, %c0_11] : memref<1x32xf32, #tpu.memory_space<vmem>>, vector<1x32xf32>
    tpu.vector_store %arg5[%c0_10, %c0_11], %18 {strides = array<i32>} : memref<1x32xf32, #tpu.memory_space<vmem>>, vector<1x32xf32>,
    return
  }
}

</mosaic_0001>

<bundles_post_ra>
// kernel: tpu_custom_call.1
= control target key start
LH: loop header
LB: loop body
LE: loop exit
PB: predicated region body
PF: predicated region fallthrough
CT: control target
= control target key end

     0   :  { %11 = vsyncpa [#allocation3], 0  ;;  %s378_s0 = inlined_call_operand.hbm [shape: f32[1,128], index: 0, kind: input, shape index: {}]   ;;  %s379_s1 = inlined_call_operand.vmem [shape: f32[1,32], index: 1, kind: input, shape index: {}]   ;;  %s380_s2 = inlined_call_operand.vmem [shape: f32[1,32], index: 2, kind: input, shape index: {}]   ;;  %s381_s3 = inlined_call_operand.hbm [shape: f32[32,128], index: 3, kind: input, shape index: {}]   ;;  %s382_s4 = inlined_call_operand.hbm [shape: f32[1,32], index: 4, kind: output, shape index: {0}]   ;;  %s383_s5 = inlined_call_operand.hbm [shape: f32[1,32], index: 5, kind: output, shape index: {1}]  }
   0x1   :  { %12 = vsyncpa [#allocation6], 0 }
   0x2   :  { %13 = vsyncpa [#allocation4], 0 }
   0x3   :  { %14 = vsyncpa [#allocation9], 0  ;;  %s318_s18 = smov [#allocation2]   ;;  %s319_s20 = smov [#allocation5]  }
   0x4   :  { %s21_s19 = sshll.u32 %s318_s18, 4  ;;  %s34_s21 = sshll.u32 %s319_s20, 4  ;;  %s22_s19 = int_to_ptr.vmem [resolvable:$true] %s21_s19  ;;  %s35_s21 = int_to_ptr.vmem [resolvable:$true] %s34_s21 }
   0x5   :  { %s238_s22 = scalar_lea.vmem %s22_s19, 16  ;;  %s242_s23 = scalar_lea.vmem %s22_s19, 32 }
   0x6   :  { %p239_p0 = scmp.ne.s32.totalorder %s22_s19, %s238_s22  ;;  %p243_p1 = scmp.lt.s32.totalorder %s22_s19, %s22_s19 }
   0x7   :  { %p244_p2 = scmp.lt.s32.totalorder %s242_s23, %s238_s22 }
   0x9   :  { %p245_p3 = por %p244_p2, %p243_p1 }
   0xb   :  { %p246_p4 = pnand %p245_p3, %p239_p0 }
   0xd   :  { %249 = shalt.err (!%p246_p4)
}
   0xe   :  { %24 = dma.hbm_to_vmem [thread:$0]  %s378_s0, 16, %s22_s19, [#allocation3]  }
   0xf   :  { %s258_s26 = scalar_lea.vmem %s35_s21, 512  ;;  %p263_p6 = scmp.lt.s32.totalorder %s35_s21, %s35_s21 }
  0x10   :  { %p259_p5 = scmp.ne.s32.totalorder %s35_s21, %s258_s26  ;;  %p264_p7 = scmp.lt.s32.totalorder %s258_s26, %s258_s26 }
  0x12   :  { %p265_p8 = por %p264_p7, %p263_p6 }
  0x14   :  { %p266_p9 = pnand %p265_p8, %p259_p5 }
  0x16   :  { %269 = shalt.err (!%p266_p9)
}
  0x17   :  { %s320_s27 = smov 128   ;;  %s321_s28 = smov 8  }
  0x18   :  { %40 = dma.hbm_to_vmem [thread:$0]  %s381_s3, 512, %s35_s21, [#allocation6], %s320_s27, %s320_s27, %s321_s28  }
  0x19   :  { %310 = dma.done.wait [#allocation3], 16  }
  0x1a   :  { %311 = vsyncadd [#allocation3], 4294967280 }
  0x1b   :  { %312 = dma.done.wait [#allocation6], 512  }
  0x1c   :  { %313 = vsyncadd [#allocation6], 4294966784  ;;  %v322_v0 = vmov 0.0   ;;  %vm323_vm0 = vmmov 0   ;;  %v50_v1 = vld [vmem:[#allocation5 + $0x18] sm:$0xff]  ;;  %v49_v2 = vld [vmem:[#allocation5 + $0x10] sm:$0xff]  ;;  %v154_v22 = vlaneseq }
  0x1d   :  { %201 = vmatprep.subr.mxu0 %v322_v0  ;;  %209 = vmatprep.mubr.msk.f32.mxu0 %vm323_vm0, %v322_v0  ;;  %v48_v3 = vld [vmem:[#allocation5 + $0x8] sm:$0xff]  ;;  %v47_v4 = vld [vmem:[#allocation5] sm:$0xff]  ;;  %v51_v5 = vld [vmem:[%s379_s1] sm:$0x1]  ;;  %vm54_vm1 = vcmask 261120   ;;  %s324_s3 = smov 96  }
  0x1e   :  { %202 = vmatpush3.msra.mxu0 %v50_v1  ;;  %v53_v6 = vld [vmem:[#allocation2] sm:$0x1]  ;;  %vm161_vm2 = vcmask 253952   ;;  %s325_s8 = smov [#allocation8]  }
  0x1f   :  { %203 = vmatprep.subr.mxu0 %v322_v0  ;;  %v52_v17 = vld [vmem:[%s380_s2] sm:$0x1]  ;;  %s180_s9 = sshll.u32 %s325_s8, 4  ;;  %s181_s9 = int_to_ptr.vmem [resolvable:$true] %s180_s9 }
  0x20   :  { %204 = vmatpush3.msra.mxu0 %v49_v2  ;;  %s270_s10 = scalar_lea.vmem %s181_s9, 16  ;;  %s274_s11 = scalar_lea.vmem %s181_s9, 32 }
  0x21   :  { %205 = vmatprep.subr.mxu0 %v322_v0  ;;  %p271_p10 = scmp.ne.s32.totalorder %s181_s9, %s270_s10  ;;  %p275_p11 = scmp.lt.s32.totalorder %s181_s9, %s181_s9 }
  0x22   :  { %206 = vmatpush3.msra.mxu0 %v48_v3  ;;  %p276_p12 = scmp.lt.s32.totalorder %s274_s11, %s270_s10 }
  0x23   :  { %207 = vmatprep.subr.mxu0 %v322_v0 }
  0x24   :  { %208 = vmatpush3.msra.mxu0 %v47_v4  ;;  %p277_p13 = por %p276_p12, %p275_p11 }
  0x25   :  { %210 = vmatmul.mubr.msk.f32.vlgmr.msra.gmra.mxu0 %vm54_vm1, %v51_v5 }
  0x26   :  { %p278_p0 = pnand %p277_p13, %p271_p10 }
  0xe5   :  { %v124_v7 = vpop.f32.mrf.mxu0 }
  0xe6   :  { %v128_v8 = vadd.f32 %v124_v7, %v53_v6 }
  0xe7   :  { %v211_v9 = vpop.f32.mrf.mxu0 }
  0xe8   :  { %222 = vtanh.f32 %v128_v8  ;;  %v195_v11 = vmul.f32 -1.442695, %v128_v8 }
  0xea   :  { %224 = vpow2.f32 %v195_v11 }
  0xf5   :  { %v223_v10 = vpop.eup %222 }
  0xf6   :  { %138 = vrot.lane.b32.xlu0 %v223_v10, %s324_s3 }
  0xf7   :  { %v225_v12 = vpop.eup %224 }
  0xf8   :  { %v132_v13 = vadd.f32 1.0, %v225_v12 }
  0xfa   :  { %226 = vrcp.f32 %v132_v13 }
 0x107   :  { %v227_v14 = vpop.eup %226 }
 0x108   :  { %v136_v18 = vmul.f32 %v227_v14, %v52_v17 }
 0x168   :  { %v139_v15 = vpop.permute.xlu0 %138 }
 0x169   :  { %v141_v16 = vmul.f32 %v227_v14, %v139_v15 }
 0x16b   :  { %143 = vrot.lane.b32.xlu0 %v141_v16, %s324_s3 }
 0x1dd   :  { %v144_v19 = vpop.permute.xlu0 %143 }
 0x1de   :  { %v146_v20 = vadd.f32 %v144_v19, %v136_v18 }
 0x1e0   :  { %228 = vtanh.f32 %v146_v20  ;;  %163 = vst.msk [vmem:[#allocation8] sm:$0x1] %vm161_vm2, %v146_v20 }
 0x1ed   :  { %v229_v21 = vpop.eup %228 }
 0x1ee   :  { %149 = vrot.lane.b32.xlu1 %v229_v21, %s324_s3 }
 0x1ef   :  { %281 = shalt.err (!%p278_p0)
}
 0x1f0   :  { %183 = dma.vmem_to_hbm [thread:$0]  %s181_s9, 16, %s383_s5, [#allocation9]   ;;  %v155_v23 = vshrl.u32 %v154_v22, 7 }
 0x1f1   :  { %s326_s13 = smov 32   ;;  %s327_s14 = smov [#allocation7]  }
 0x1f2   :  { %v156_v24 = vsub.s32 0, %v155_v23  ;;  %s170_s15 = sshll.u32 %s327_s14, 4  ;;  %s171_s15 = int_to_ptr.vmem [resolvable:$true] %s170_s15 }
 0x1f3   :  { %s290_s16 = scalar_lea.vmem %s171_s15, 16  ;;  %s294_s17 = scalar_lea.vmem %s171_s15, 32 }
 0x1f4   :  { %p291_p1 = scmp.ne.s32.totalorder %s171_s15, %s290_s16  ;;  %p295_p2 = scmp.lt.s32.totalorder %s171_s15, %s171_s15 }
 0x1f5   :  { %p296_p3 = scmp.lt.s32.totalorder %s294_s17, %s290_s16 }
 0x1f7   :  { %p297_p4 = por %p296_p3, %p295_p2 }
 0x1f9   :  { %p298_p5 = pnand %p297_p4, %p291_p1 }
 0x260   :  { %v150_v25 = vpop.permute.xlu1 %149 }
 0x261   :  { %v152_v26 = vmul.f32 %v227_v14, %v150_v25 }
 0x263   :  { %v157_v27 = vrot.slane %v152_v26, %v156_v24 }
 0x265   :  { %158 = vrot.lane.b32.xlu1 %v157_v27, %s326_s13 }
 0x2d7   :  { %v159_v28 = vpop.permute.xlu1 %158 }
 0x2d8   :  { %162 = vst.msk [vmem:[#allocation7] sm:$0x1] %vm161_vm2, %v159_v28 }
 0x2d9   :  { %301 = shalt.err (!%p298_p5)
}
 0x2da   :  { %173 = dma.vmem_to_hbm [thread:$0]  %s171_s15, 16, %s382_s4, [#allocation4]  }
 0x2db   :  { %314 = dma.done.wait [#allocation4], 16  }
 0x2dc   :  { %315 = vsyncadd [#allocation4], 4294967280 }
 0x2dd   :  { %316 = dma.done.wait [#allocation9], 16  }
 0x2de   :  { %317 = vsyncadd [#allocation9], 4294967280 }
 0x2df   :  { %190 = vsyncpa [#allocation3], 1 }
 0x2e0   :  { %191 = vsyncpa [#allocation6], 1 }
 0x2e1   :  { %192 = vsyncpa [#allocation4], 1 }
 0x2e2   :  { %193 = vsyncpa [#allocation9], 1 }

</bundles_post_ra>
